<compile_context>
chip_gen: v7x
topology: tpu7x:2x2x1
jax: 0.10.0
libtpu: 0.0.40
codegen_flags: <defaults>
</compile_context>

<pallas_src>
import functools

import jax
import jax.numpy as jnp
from jax.experimental import pallas as pl
from jax.experimental.pallas import tpu as pltpu


def _round_up(x: int, m: int) -> int:
    return (x + m - 1) // m * m


def _vmem_capacity_bytes() -> int:
    """Physical VMEM per TensorCore (64 MiB on v7x, 128 MiB on v5e/v6e)."""
    try:
        cap = int(getattr(pltpu.get_tpu_info(), "vmem_capacity_bytes", 0) or 0)
        if cap > 0:
            return cap
    except Exception:
        pass
    return 64 << 20  # conservative default (v7x-sized)


def router_kernel(x_ref, w1_ref, b1_ref, w2_ref, b2_ref, out_ref, acc_ref, *,
                  inv_hw: float, n_lane_chunks: int):
    # x_ref: (TB, C, THW)   w1: (C, Hp) bf16   b1: (1, Hp) f32
    # w2: (Hp, Ep) bf16     b2: (1, Ep) f32    acc: (TB, C, 128) f32
    k = pl.program_id(1)

    @pl.when(k == 0)
    def _():
        acc_ref[...] = jnp.zeros_like(acc_ref)

    # Hot streaming loop: pure element-wise (VPU) adds into a lane-shaped
    # accumulator. No per-step cross-lane (XLU) reduce or layout change; those
    # happen exactly once per batch tile in the finalize block below.
    for j in range(n_lane_chunks):
        acc_ref[...] += x_ref[:, :, pl.ds(j * 128, 128)].astype(jnp.float32)

    @pl.when(k == pl.num_programs(1) - 1)
    def _():
        # Single XLU reduce + sublane->lane relayout; AdaptiveAvgPool2d(1) is a
        # single 1/HW scale of the raw spatial sum.
        pooled = jnp.sum(acc_ref[...], axis=-1) * inv_hw              # (TB, C)

        # Linear(C -> C//2) + ReLU (bf16-stored weights, f32 math/accum).
        h = jnp.dot(pooled, w1_ref[...].astype(jnp.float32),
                    preferred_element_type=jnp.float32) + b1_ref[...]
        h = jnp.maximum(h, 0.0)

        # TODO(synk): Dropout(0.1) is identity in eval mode; training would
        # need pltpu.prng_seed + pltpu.stateful_bernoulli.

        # Linear(C//2 -> E); padded expert columns carry bias -1e30.
        logits = jnp.dot(h, w2_ref[...].astype(jnp.float32),
                         preferred_element_type=jnp.float32) + b2_ref[...]

        # Numerically stable softmax; exact divide on the cold path so routing
        # weights sum to 1 at f32 precision.
        m = jnp.max(logits, axis=-1, keepdims=True)
        e = jnp.exp(logits - m)
        s = jnp.sum(e, axis=-1, keepdims=True)
        out_ref[...] = e / s


def router_forward(x_nchw, w1, b1, w2, b2, *, tb=None, thw=None,
                   param_dtype=jnp.bfloat16):
    """Router forward.

    x_nchw: (B, C, H, W); w1: (C, C//2); b1: (C//2,)|(1,C//2); w2: (C//2, E);
    b2: (E,)|(1,E). Returns softmax routing weights (B, E) float32.
    """
    B, C, H, W = x_nchw.shape
    HW = H * W
    Hd = w1.shape[1]
    E = w2.shape[1]

    b1 = b1.reshape(1, -1)
    b2 = b2.reshape(1, -1)

    itemsize = jnp.dtype(x_nchw.dtype).itemsize
    w_itemsize = jnp.dtype(param_dtype).itemsize
    c_pad = _round_up(C, 8)                     # sublane padding of the x tile
    Hd_pad = _round_up(Hd, 128)
    E_pad = _round_up(E, 128)

    vmem_cap = _vmem_capacity_bytes()

    # Resident parameters (constant index_map -> fetched once, but the default
    # pipeline still double-buffers them; account for 2x).
    param_bytes = 2 * (C * Hd_pad * w_itemsize + Hd_pad * E_pad * w_itemsize
                       + (Hd_pad + E_pad) * 4)

    # ---- batch tile ---------------------------------------------------------
    if tb is None:
        tb = min(128, _round_up(B, 8))
        if B > 8 and _round_up(B, 8) // tb < 2:
            # Keep >= 2 batch tiles so both v7x TensorCores get work on the
            # "parallel" axis.
            tb = _round_up((B + 1) // 2, 8)
        # Keep the lane-shaped (tb, C, 128) accumulator within ~1/8 of VMEM.
        max_tb_acc = max(8, (vmem_cap // 8) // (C * 128 * 4) // 8 * 8)
        tb = min(tb, max_tb_acc)
        # TODO(synk): for B <= 8 on v7x the batch axis has a single tile; using
        # the 2nd TensorCore would need an HW split with per-core partial sums.
    tb = max(8, _round_up(tb, 8))

    def _need(tb_, thw_):
        return (2 * tb_ * c_pad * thw_ * itemsize    # double-buffered x tile
                + tb_ * C * 128 * 4                  # pooled-sum accumulator
                + param_bytes                        # resident weights/biases
                + 2 * tb_ * E_pad * 4                # output block
                + (6 << 20))                         # Mosaic internal scratch

    # ---- HW (lane) tile: generation-aware budget ----------------------------
    reserve = param_bytes + tb * C * 128 * 4 + 2 * tb * E_pad * 4 + (6 << 20)
    if thw is None:
        x_budget = max(int(vmem_cap * 0.70) - reserve,
                       2 * tb * c_pad * 128 * itemsize)
        thw = (x_budget // (2 * tb * c_pad * itemsize)) // 128 * 128
        thw = max(512, thw)                        # >=512 lanes ~85% of HBM BW
        thw = min(thw, 4096, _round_up(HW, 128))   # cap unroll length
    thw = max(128, _round_up(thw, 128))

    # ---- VMEM-fit guard (matters for large C on v7x's 64 MiB VMEM) ----------
    while thw > 128 and _need(tb, thw) > vmem_cap:
        thw -= 128
    while tb > 8 and _need(tb, thw) > vmem_cap:
        tb -= 8
    assert _need(tb, thw) <= vmem_cap, (
        f"Router tile does not fit VMEM (C={C}, tb={tb}, thw={thw}); "
        "a C-chunk grid axis would be required.")
    # TODO(synk): add an 'arbitrary' C-chunk grid axis for very large C instead
    # of asserting.

    B_pad = _round_up(B, tb)
    HW_pad = _round_up(HW, thw)

    # ---- padding (zeros along B / HW keep the spatial sums exact) -----------
    x = x_nchw.reshape(B, C, HW)                 # keep native dtype (bf16 ok)
    if (B_pad, HW_pad) != (B, HW):
        x = jnp.pad(x, ((0, B_pad - B), (0, 0), (0, HW_pad - HW)))

    w1p = jnp.pad(w1, ((0, 0), (0, Hd_pad - Hd))).astype(param_dtype)
    b1p = jnp.pad(b1.astype(jnp.float32), ((0, 0), (0, Hd_pad - Hd)))
    w2p = jnp.pad(w2, ((0, Hd_pad - Hd), (0, E_pad - E))).astype(param_dtype)
    # Padded expert columns get a huge negative bias -> exactly 0 softmax mass.
    b2p = jnp.pad(b2.astype(jnp.float32), ((0, 0), (0, E_pad - E)),
                  constant_values=-1e30)

    grid = (B_pad // tb, HW_pad // thw)

    vmem_limit = int(min(vmem_cap, max(32 << 20, _need(tb, thw) + (8 << 20))))

    kernel = functools.partial(router_kernel, inv_hw=1.0 / float(HW),
                               n_lane_chunks=thw // 128)

    out_padded = pl.pallas_call(
        kernel,
        out_shape=jax.ShapeDtypeStruct((B_pad, E_pad), jnp.float32),
        grid_spec=pltpu.PrefetchScalarGridSpec(
            num_scalar_prefetch=0,
            grid=grid,
            in_specs=[
                pl.BlockSpec((tb, C, thw), lambda i, k: (i, 0, k)),    # x (streamed)
                pl.BlockSpec((C, Hd_pad), lambda i, k: (0, 0)),        # w1 (bf16, resident)
                pl.BlockSpec((1, Hd_pad), lambda i, k: (0, 0)),        # b1 (f32)
                pl.BlockSpec((Hd_pad, E_pad), lambda i, k: (0, 0)),    # w2 (bf16, resident)
                pl.BlockSpec((1, E_pad), lambda i, k: (0, 0)),         # b2 (f32)
            ],
            out_specs=pl.BlockSpec((tb, E_pad), lambda i, k: (i, 0)),
            scratch_shapes=[pltpu.VMEM((tb, C, 128), jnp.float32)],    # lane-shaped acc
        ),
        compiler_params=pltpu.CompilerParams(
            dimension_semantics=("parallel", "arbitrary"),
            vmem_limit_bytes=vmem_limit,
        ),
    )(x, w1p, b1p, w2p, b2p)

    return out_padded[:B, :E]


def init_router_params(key, in_ch: int, n_experts: int):
    """Deterministic init mimicking torch.nn.Linear defaults (uniform +-1/sqrt(fan_in))."""
    hidden = in_ch // 2
    k1, k2, k3, k4 = jax.random.split(key, 4)
    lim1 = 1.0 / jnp.sqrt(jnp.float32(in_ch))
    lim2 = 1.0 / jnp.sqrt(jnp.float32(hidden))
    w1 = jax.random.uniform(k1, (in_ch, hidden), jnp.float32, -lim1, lim1)
    b1 = jax.random.uniform(k2, (1, hidden), jnp.float32, -lim1, lim1)
    w2 = jax.random.uniform(k3, (hidden, n_experts), jnp.float32, -lim2, lim2)
    b2 = jax.random.uniform(k4, (1, n_experts), jnp.float32, -lim2, lim2)
    return w1, b1, w2, b2


if __name__ == "__main__":
    key = jax.random.PRNGKey(0)
    B, C, H, W = 2, 4, 32, 32
    n_experts = 4

    kx, kp = jax.random.split(key)
    x = jax.random.normal(kx, (B, C, H, W), jnp.float32)
    w1, b1, w2, b2 = init_router_params(kp, C, n_experts)

    # Reference check in plain JAX (eval-mode semantics, f32 weights).
    pooled = jnp.mean(x.reshape(B, C, -1), axis=-1)
    h = jnp.maximum(pooled @ w1 + b1, 0.0)
    ref = jax.nn.softmax(h @ w2 + b2, axis=-1)

    # 1) fully automatic (generation-aware) tiling — single HW step here.
    out1 = jax.block_until_ready(router_forward(x, w1, b1, w2, b2))
    # 2) thw=512 (>= the 512-lane floor) forces two HW reduction steps,
    #    exercising the accumulate-then-finalize path of the tiled kernel.
    out2 = jax.block_until_ready(router_forward(x, w1, b1, w2, b2, thw=512))

    for out in (out1, out2):
        assert out.shape == (B, n_experts)
        err = float(jnp.max(jnp.abs(out - ref)))
        # Tolerance accounts for bf16 weight storage inside the kernel.
        assert jnp.allclose(out, ref, atol=1e-2), f"max abs err = {err}"
        # Exact softmax divide -> rows sum to 1 at f32 precision.
        assert jnp.allclose(jnp.sum(out, axis=-1), 1.0, atol=1e-4)

    print("KERNEL_OK")
</pallas_src>

<mosaic_0001>
module attributes {stable_mosaic.version = 11 : i64} {
  func.func @router_kernel(%arg0: i32, %arg1: i32, %arg2: memref<8x4x1024xf32, #tpu.memory_space<vmem>>, %arg3: memref<4x128xbf16, #tpu.memory_space<vmem>>, %arg4: memref<1x128xf32, #tpu.memory_space<vmem>>, %arg5: memref<128x128xbf16, #tpu.memory_space<vmem>>, %arg6: memref<1x128xf32, #tpu.memory_space<vmem>>, %arg7: memref<8x128xf32, #tpu.memory_space<vmem>>, %arg8: memref<8x4x128xf32, #tpu.memory_space<vmem>>) attributes {dimension_semantics = [#tpu.dimension_semantics<parallel>, #tpu.dimension_semantics<arbitrary>], iteration_bounds = array<i64: 1, 1>, scalar_prefetch = 0 : i64, scratch_operands = 1 : i64, tpu.core_type = #tpu.core_type<tc>, window_params = [{transform_indices = @transform_0, window_bounds = array<i64: 8, 4, 1024>}, {pipeline_mode = #tpu.pipeline_mode<synchronous>, transform_indices = @transform_1, window_bounds = array<i64: 4, 128>}, {pipeline_mode = #tpu.pipeline_mode<synchronous>, transform_indices = @transform_2, window_bounds = array<i64: 1, 128>}, {pipeline_mode = #tpu.pipeline_mode<synchronous>, transform_indices = @transform_3, window_bounds = array<i64: 128, 128>}, {pipeline_mode = #tpu.pipeline_mode<synchronous>, transform_indices = @transform_4, window_bounds = array<i64: 1, 128>}, {transform_indices = @transform_5, window_bounds = array<i64: 8, 128>}]} {
    %c0_i32 = arith.constant 0 : i32
    %0 = arith.cmpi eq, %arg1, %c0_i32 : i32
    %1 = arith.extui %0 : i1 to i32
    %c0_i32_0 = arith.constant 0 : i32
    %2 = arith.cmpi ne, %1, %c0_i32_0 : i32
    scf.if %2 {
      %cst = arith.constant 0.000000e+00 : f32
      %38 = vector.broadcast %cst : f32 to vector<8x4x128xf32>
      %c0_67 = arith.constant 0 : index
      %c0_68 = arith.constant 0 : index
      %c0_69 = arith.constant 0 : index
      %39 = vector.load %arg8[%c0_67, %c0_68, %c0_69] : memref<8x4x128xf32, #tpu.memory_space<vmem>>, vector<8x4x128xf32>
      tpu.vector_store %arg8[%c0_67, %c0_68, %c0_69], %38 {strides = array<i32>} : memref<8x4x128xf32, #tpu.memory_space<vmem>>, vector<8x4x128xf32>,
    } else {
    }
    %c0 = arith.constant 0 : index
    %c0_1 = arith.constant 0 : index
    %c0_2 = arith.constant 0 : index
    %3 = vector.load %arg8[%c0, %c0_1, %c0_2] : memref<8x4x128xf32, #tpu.memory_space<vmem>>, vector<8x4x128xf32>
    %c0_3 = arith.constant 0 : index
    %c0_4 = arith.constant 0 : index
    %c0_5 = arith.constant 0 : index
    %4 = vector.load %arg2[%c0_3, %c0_4, %c0_5] : memref<8x4x1024xf32, #tpu.memory_space<vmem>>, vector<8x4x128xf32>
    %5 = arith.addf %3, %4 : vector<8x4x128xf32>
    %c0_6 = arith.constant 0 : index
    %c0_7 = arith.constant 0 : index
    %c0_8 = arith.constant 0 : index
    %6 = vector.load %arg8[%c0_6, %c0_7, %c0_8] : memref<8x4x128xf32, #tpu.memory_space<vmem>>, vector<8x4x128xf32>
    tpu.vector_store %arg8[%c0_6, %c0_7, %c0_8], %5 {strides = array<i32>} : memref<8x4x128xf32, #tpu.memory_space<vmem>>, vector<8x4x128xf32>,
    %c0_9 = arith.constant 0 : index
    %c0_10 = arith.constant 0 : index
    %c0_11 = arith.constant 0 : index
    %7 = vector.load %arg8[%c0_9, %c0_10, %c0_11] : memref<8x4x128xf32, #tpu.memory_space<vmem>>, vector<8x4x128xf32>
    %c0_12 = arith.constant 0 : index
    %c0_13 = arith.constant 0 : index
    %c128 = arith.constant 128 : index
    %8 = vector.load %arg2[%c0_12, %c0_13, %c128] : memref<8x4x1024xf32, #tpu.memory_space<vmem>>, vector<8x4x128xf32>
    %9 = arith.addf %7, %8 : vector<8x4x128xf32>
    %c0_14 = arith.constant 0 : index
    %c0_15 = arith.constant 0 : index
    %c0_16 = arith.constant 0 : index
    %10 = vector.load %arg8[%c0_14, %c0_15, %c0_16] : memref<8x4x128xf32, #tpu.memory_space<vmem>>, vector<8x4x128xf32>
    tpu.vector_store %arg8[%c0_14, %c0_15, %c0_16], %9 {strides = array<i32>} : memref<8x4x128xf32, #tpu.memory_space<vmem>>, vector<8x4x128xf32>,
    %c0_17 = arith.constant 0 : index
    %c0_18 = arith.constant 0 : index
    %c0_19 = arith.constant 0 : index
    %11 = vector.load %arg8[%c0_17, %c0_18, %c0_19] : memref<8x4x128xf32, #tpu.memory_space<vmem>>, vector<8x4x128xf32>
    %c0_20 = arith.constant 0 : index
    %c0_21 = arith.constant 0 : index
    %c256 = arith.constant 256 : index
    %12 = vector.load %arg2[%c0_20, %c0_21, %c256] : memref<8x4x1024xf32, #tpu.memory_space<vmem>>, vector<8x4x128xf32>
    %13 = arith.addf %11, %12 : vector<8x4x128xf32>
    %c0_22 = arith.constant 0 : index
    %c0_23 = arith.constant 0 : index
    %c0_24 = arith.constant 0 : index
    %14 = vector.load %arg8[%c0_22, %c0_23, %c0_24] : memref<8x4x128xf32, #tpu.memory_space<vmem>>, vector<8x4x128xf32>
    tpu.vector_store %arg8[%c0_22, %c0_23, %c0_24], %13 {strides = array<i32>} : memref<8x4x128xf32, #tpu.memory_space<vmem>>, vector<8x4x128xf32>,
    %c0_25 = arith.constant 0 : index
    %c0_26 = arith.constant 0 : index
    %c0_27 = arith.constant 0 : index
    %15 = vector.load %arg8[%c0_25, %c0_26, %c0_27] : memref<8x4x128xf32, #tpu.memory_space<vmem>>, vector<8x4x128xf32>
    %c0_28 = arith.constant 0 : index
    %c0_29 = arith.constant 0 : index
    %c384 = arith.constant 384 : index
    %16 = vector.load %arg2[%c0_28, %c0_29, %c384] : memref<8x4x1024xf32, #tpu.memory_space<vmem>>, vector<8x4x128xf32>
    %17 = arith.addf %15, %16 : vector<8x4x128xf32>
    %c0_30 = arith.constant 0 : index
    %c0_31 = arith.constant 0 : index
    %c0_32 = arith.constant 0 : index
    %18 = vector.load %arg8[%c0_30, %c0_31, %c0_32] : memref<8x4x128xf32, #tpu.memory_space<vmem>>, vector<8x4x128xf32>
    tpu.vector_store %arg8[%c0_30, %c0_31, %c0_32], %17 {strides = array<i32>} : memref<8x4x128xf32, #tpu.memory_space<vmem>>, vector<8x4x128xf32>,
    %c0_33 = arith.constant 0 : index
    %c0_34 = arith.constant 0 : index
    %c0_35 = arith.constant 0 : index
    %19 = vector.load %arg8[%c0_33, %c0_34, %c0_35] : memref<8x4x128xf32, #tpu.memory_space<vmem>>, vector<8x4x128xf32>
    %c0_36 = arith.constant 0 : index
    %c0_37 = arith.constant 0 : index
    %c512 = arith.constant 512 : index
    %20 = vector.load %arg2[%c0_36, %c0_37, %c512] : memref<8x4x1024xf32, #tpu.memory_space<vmem>>, vector<8x4x128xf32>
    %21 = arith.addf %19, %20 : vector<8x4x128xf32>
    %c0_38 = arith.constant 0 : index
    %c0_39 = arith.constant 0 : index
    %c0_40 = arith.constant 0 : index
    %22 = vector.load %arg8[%c0_38, %c0_39, %c0_40] : memref<8x4x128xf32, #tpu.memory_space<vmem>>, vector<8x4x128xf32>
    tpu.vector_store %arg8[%c0_38, %c0_39, %c0_40], %21 {strides = array<i32>} : memref<8x4x128xf32, #tpu.memory_space<vmem>>, vector<8x4x128xf32>,
    %c0_41 = arith.constant 0 : index
    %c0_42 = arith.constant 0 : index
    %c0_43 = arith.constant 0 : index
    %23 = vector.load %arg8[%c0_41, %c0_42, %c0_43] : memref<8x4x128xf32, #tpu.memory_space<vmem>>, vector<8x4x128xf32>
    %c0_44 = arith.constant 0 : index
    %c0_45 = arith.constant 0 : index
    %c640 = arith.constant 640 : index
    %24 = vector.load %arg2[%c0_44, %c0_45, %c640] : memref<8x4x1024xf32, #tpu.memory_space<vmem>>, vector<8x4x128xf32>
    %25 = arith.addf %23, %24 : vector<8x4x128xf32>
    %c0_46 = arith.constant 0 : index
    %c0_47 = arith.constant 0 : index
    %c0_48 = arith.constant 0 : index
    %26 = vector.load %arg8[%c0_46, %c0_47, %c0_48] : memref<8x4x128xf32, #tpu.memory_space<vmem>>, vector<8x4x128xf32>
    tpu.vector_store %arg8[%c0_46, %c0_47, %c0_48], %25 {strides = array<i32>} : memref<8x4x128xf32, #tpu.memory_space<vmem>>, vector<8x4x128xf32>,
    %c0_49 = arith.constant 0 : index
    %c0_50 = arith.constant 0 : index
    %c0_51 = arith.constant 0 : index
    %27 = vector.load %arg8[%c0_49, %c0_50, %c0_51] : memref<8x4x128xf32, #tpu.memory_space<vmem>>, vector<8x4x128xf32>
    %c0_52 = arith.constant 0 : index
    %c0_53 = arith.constant 0 : index
    %c768 = arith.constant 768 : index
    %28 = vector.load %arg2[%c0_52, %c0_53, %c768] : memref<8x4x1024xf32, #tpu.memory_space<vmem>>, vector<8x4x128xf32>
    %29 = arith.addf %27, %28 : vector<8x4x128xf32>
    %c0_54 = arith.constant 0 : index
    %c0_55 = arith.constant 0 : index
    %c0_56 = arith.constant 0 : index
    %30 = vector.load %arg8[%c0_54, %c0_55, %c0_56] : memref<8x4x128xf32, #tpu.memory_space<vmem>>, vector<8x4x128xf32>
    tpu.vector_store %arg8[%c0_54, %c0_55, %c0_56], %29 {strides = array<i32>} : memref<8x4x128xf32, #tpu.memory_space<vmem>>, vector<8x4x128xf32>,
    %c0_57 = arith.constant 0 : index
    %c0_58 = arith.constant 0 : index
    %c0_59 = arith.constant 0 : index
    %31 = vector.load %arg8[%c0_57, %c0_58, %c0_59] : memref<8x4x128xf32, #tpu.memory_space<vmem>>, vector<8x4x128xf32>
    %c0_60 = arith.constant 0 : index
    %c0_61 = arith.constant 0 : index
    %c896 = arith.constant 896 : index
    %32 = vector.load %arg2[%c0_60, %c0_61, %c896] : memref<8x4x1024xf32, #tpu.memory_space<vmem>>, vector<8x4x128xf32>
    %33 = arith.addf %31, %32 : vector<8x4x128xf32>
    %c0_62 = arith.constant 0 : index
    %c0_63 = arith.constant 0 : index
    %c0_64 = arith.constant 0 : index
    %34 = vector.load %arg8[%c0_62, %c0_63, %c0_64] : memref<8x4x128xf32, #tpu.memory_space<vmem>>, vector<8x4x128xf32>
    tpu.vector_store %arg8[%c0_62, %c0_63, %c0_64], %33 {strides = array<i32>} : memref<8x4x128xf32, #tpu.memory_space<vmem>>, vector<8x4x128xf32>,
    %c0_i32_65 = arith.constant 0 : i32
    %35 = arith.cmpi eq, %arg1, %c0_i32_65 : i32
    %36 = arith.extui %35 : i1 to i32
    %c0_i32_66 = arith.constant 0 : i32
    %37 = arith.cmpi ne, %36, %c0_i32_66 : i32
    scf.if %37 {
      %c0_67 = arith.constant 0 : index
      %c0_68 = arith.constant 0 : index
      %c0_69 = arith.constant 0 : index
      %38 = vector.load %arg8[%c0_67, %c0_68, %c0_69] : memref<8x4x128xf32, #tpu.memory_space<vmem>>, vector<8x4x128xf32>
      %cst = arith.constant dense<0.000000e+00> : vector<8x4xf32>
      %39 = vector.multi_reduction <add>, %38, %cst [2] : vector<8x4x128xf32> to vector<8x4xf32>
      %cst_70 = arith.constant 9.765625E-4 : f32
      %40 = vector.broadcast %cst_70 : f32 to vector<8x4xf32>
      %41 = arith.mulf %39, %40 : vector<8x4xf32>
      %c0_71 = arith.constant 0 : index
      %c0_72 = arith.constant 0 : index
      %42 = vector.load %arg3[%c0_71, %c0_72] : memref<4x128xbf16, #tpu.memory_space<vmem>>, vector<4x128xbf16>
      %43 = arith.extf %42 : vector<4x128xbf16> to vector<4x128xf32>
      %cst_73 = arith.constant dense<0.000000e+00> : vector<8x128xf32>
      %44 = tpu.matmul %41, %43, %cst_73 {dimension_numbers = #tpu.dot_dimension_numbers<[1], [0], [0], [1], [0, 0, 1, 1], [], []>} : vector<8x4xf32>, vector<4x128xf32>, vector<8x128xf32> -> vector<8x128xf32>
      %c0_74 = arith.constant 0 : index
      %c0_75 = arith.constant 0 : index
      %45 = vector.load %arg4[%c0_74, %c0_75] : memref<1x128xf32, #tpu.memory_space<vmem>>, vector<1x128xf32>
      %46 = vector.broadcast %45 : vector<1x128xf32> to vector<8x128xf32>
      %47 = arith.addf %44, %46 : vector<8x128xf32>
      %cst_76 = arith.constant 0.000000e+00 : f32
      %48 = vector.broadcast %cst_76 : f32 to vector<8x128xf32>
      %49 = arith.maximumf %47, %48 : vector<8x128xf32>
      %c0_77 = arith.constant 0 : index
      %c0_78 = arith.constant 0 : index
      %50 = vector.load %arg5[%c0_77, %c0_78] : memref<128x128xbf16, #tpu.memory_space<vmem>>, vector<128x128xbf16>
      %51 = arith.extf %50 : vector<128x128xbf16> to vector<128x128xf32>
      %cst_79 = arith.constant dense<0.000000e+00> : vector<8x128xf32>
      %52 = tpu.matmul %49, %51, %cst_79 {dimension_numbers = #tpu.dot_dimension_numbers<[1], [0], [0], [1], [0, 0, 1, 1], [], []>} : vector<8x128xf32>, vector<128x128xf32>, vector<8x128xf32> -> vector<8x128xf32>
      %c0_80 = arith.constant 0 : index
      %c0_81 = arith.constant 0 : index
      %53 = vector.load %arg6[%c0_80, %c0_81] : memref<1x128xf32, #tpu.memory_space<vmem>>, vector<1x128xf32>
      %54 = vector.broadcast %53 : vector<1x128xf32> to vector<8x128xf32>
      %55 = arith.addf %52, %54 : vector<8x128xf32>
      %cst_82 = arith.constant dense<0xFF800000> : vector<8xf32>
      %56 = vector.multi_reduction <maximumf>, %55, %cst_82 [1] : vector<8x128xf32> to vector<8xf32>
      %57 = vector.shape_cast %56 : vector<8xf32> to vector<8x1xf32>
      %58 = vector.broadcast %57 : vector<8x1xf32> to vector<8x128xf32>
      %59 = arith.subf %55, %58 : vector<8x128xf32>
      %60 = math.exp %59 : vector<8x128xf32>
      %cst_83 = arith.constant dense<0.000000e+00> : vector<8xf32>
      %61 = vector.multi_reduction <add>, %60, %cst_83 [1] : vector<8x128xf32> to vector<8xf32>
      %62 = vector.shape_cast %61 : vector<8xf32> to vector<8x1xf32>
      %63 = vector.broadcast %62 : vector<8x1xf32> to vector<8x128xf32>
      %64 = arith.divf %60, %63 : vector<8x128xf32>
      %c0_84 = arith.constant 0 : index
      %c0_85 = arith.constant 0 : index
      %65 = vector.load %arg7[%c0_84, %c0_85] : memref<8x128xf32, #tpu.memory_space<vmem>>, vector<8x128xf32>
      tpu.vector_store %arg7[%c0_84, %c0_85], %64 {strides = array<i32>} : memref<8x128xf32, #tpu.memory_space<vmem>>, vector<8x128xf32>,
    } else {
    }
    return
  }
  func.func @transform_0(%arg0: i32, %arg1: i32) -> (i32, i32, i32) {
    %c0_i32 = arith.constant 0 : i32
    %c0_i32_0 = arith.constant 0 : i32
    return %arg0, %c0_i32, %arg1 : i32, i32, i32
  }
  func.func @transform_1(%arg0: i32, %arg1: i32) -> (i32, i32) {
    %c0_i32 = arith.constant 0 : i32
    %c0_i32_0 = arith.constant 0 : i32
    %c0_i32_1 = arith.constant 0 : i32
    return %c0_i32, %c0_i32_0 : i32, i32
  }
  func.func @transform_2(%arg0: i32, %arg1: i32) -> (i32, i32) {
    %c0_i32 = arith.constant 0 : i32
    %c0_i32_0 = arith.constant 0 : i32
    %c0_i32_1 = arith.constant 0 : i32
    return %c0_i32, %c0_i32_0 : i32, i32
  }
  func.func @transform_3(%arg0: i32, %arg1: i32) -> (i32, i32) {
    %c0_i32 = arith.constant 0 : i32
    %c0_i32_0 = arith.constant 0 : i32
    %c0_i32_1 = arith.constant 0 : i32
    return %c0_i32, %c0_i32_0 : i32, i32
  }
  func.func @transform_4(%arg0: i32, %arg1: i32) -> (i32, i32) {
    %c0_i32 = arith.constant 0 : i32
    %c0_i32_0 = arith.constant 0 : i32
    %c0_i32_1 = arith.constant 0 : i32
    return %c0_i32, %c0_i32_0 : i32, i32
  }
  func.func @transform_5(%arg0: i32, %arg1: i32) -> (i32, i32) {
    %c0_i32 = arith.constant 0 : i32
    %c0_i32_0 = arith.constant 0 : i32
    return %arg0, %c0_i32 : i32, i32
  }
}

</mosaic_0001>

<bundles_post_ra>
// kernel: tpu_custom_call.1
= control target key start
LH: loop header
LB: loop body
LE: loop exit
PB: predicated region body
PF: predicated region fallthrough
CT: control target
= control target key end

     0   :  { %10 = vsyncpa [#allocation4], 0  ;;  %s955_s0 = inlined_call_operand.hbm [shape: f32[8,4,1024], index: 0, kind: input, shape index: {}]   ;;  %s956_s1 = inlined_call_operand.vmem [shape: bf16[4,128], index: 1, kind: input, shape index: {}]   ;;  %s957_s2 = inlined_call_operand.vmem [shape: f32[1,128], index: 2, kind: input, shape index: {}]   ;;  %s958_s3 = inlined_call_operand.hbm [shape: bf16[128,128], index: 3, kind: input, shape index: {}]   ;;  %s959_s4 = inlined_call_operand.vmem [shape: f32[1,128], index: 4, kind: input, shape index: {}]   ;;  %s960_s5 = inlined_call_operand.hbm [shape: f32[8,128], index: 5, kind: output, shape index: {}]  }
   0x1   :  { %11 = vsyncpa [#allocation7], 0 }
   0x2   :  { %12 = vsyncpa [#allocation5], 0  ;;  %s850_s18 = smov [#allocation3]   ;;  %s778_s22 = scalar_lea.hbm %s955_s0, 4096 }
   0x3   :  { %s18_s19 = sshll.u32 %s850_s18, 4  ;;  %p779_p0 = scmp.ne.s32.totalorder %s955_s0, %s778_s22  ;;  %s19_s19 = int_to_ptr.vmem [resolvable:$true] %s18_s19 }
   0x4   :  { %p782_p1 = scmp.lt.u32.totalorder %s778_s22, %s955_s0 }
   0x6   :  { %p784_p2 = pnand %p782_p1, %p779_p0 }
   0x8   :  { %787 = shalt.err (!%p784_p2)
}
   0x9   :  { %s788_s27 = scalar_lea.vmem %s19_s19, 4096  ;;  %p793_p4 = scmp.lt.s32.totalorder %s19_s19, %s19_s19 }
   0xa   :  { %p789_p3 = scmp.ne.s32.totalorder %s19_s19, %s788_s27  ;;  %p794_p5 = scmp.lt.s32.totalorder %s788_s27, %s788_s27 }
   0xc   :  { %p795_p6 = por %p794_p5, %p793_p4 }
   0xe   :  { %p796_p7 = pnand %p795_p6, %p789_p3 }
  0x10   :  { %799 = shalt.err (!%p796_p7)
}
  0x11   :  { %s851_s28 = smov 512   ;;  %s852_s29 = smov 32  }
  0x12   :  { %24 = dma.hbm_to_vmem [thread:$0]  %s955_s0, 4096, %s19_s19, [#allocation4], %s851_s28, %s851_s28, %s852_s29  }
  0x13   :  { %s853_s7 = smov [#allocation6]   ;;  %s800_s11 = scalar_lea.hbm %s958_s3, 1024 }
  0x14   :  { %s34_s8 = sshll.u32 %s853_s7, 4  ;;  %p801_p8 = scmp.ne.s32.totalorder %s958_s3, %s800_s11  ;;  %s35_s8 = int_to_ptr.vmem [resolvable:$true] %s34_s8 }
  0x15   :  { %p804_p9 = scmp.lt.u32.totalorder %s800_s11, %s958_s3 }
  0x17   :  { %p806_p10 = pnand %p804_p9, %p801_p8 }
  0x19   :  { %809 = shalt.err (!%p806_p10)
}
  0x1a   :  { %s810_s16 = scalar_lea.vmem %s35_s8, 1024  ;;  %p815_p12 = scmp.lt.s32.totalorder %s35_s8, %s35_s8 }
  0x1b   :  { %p811_p11 = scmp.ne.s32.totalorder %s35_s8, %s810_s16  ;;  %p816_p13 = scmp.lt.s32.totalorder %s810_s16, %s810_s16 }
  0x1d   :  { %p817_p0 = por %p816_p13, %p815_p12 }
  0x1f   :  { %p818_p1 = pnand %p817_p0, %p811_p11 }
  0x21   :  { %821 = shalt.err (!%p818_p1)
}
  0x22   :  { %s854_s0 = smov 64   ;;  %s855_s17 = smov 4  }
  0x23   :  { %40 = dma.hbm_to_vmem [thread:$0]  %s958_s3, 1024, %s35_s8, [#allocation7], %s854_s0, %s854_s0, %s855_s17  }
  0x24   :  { %844 = dma.done.wait [#allocation4], 4096  }
  0x25   :  { %845 = vsyncadd [#allocation4], 4294963200 }
  0x26   :  { %846 = dma.done.wait [#allocation7], 1024  }
  0x27   :  { %847 = vsyncadd [#allocation7], 4294966272  ;;  %v856_v0 = vmov 0.0   ;;  %v69_v1 = vld [vmem:[#allocation3] sm:$0xf]  ;;  %vm328_vm0 = vcmask 1043456  }
  0x28   :  { %53 = vst [vmem:[#allocation2] sm:$0xf] %v856_v0  ;;  %54 = vst [vmem:[#allocation2 + $0x4] sm:$0xf] %v856_v0  ;;  %700 = vmatprep.subr.mxu0 %v856_v0  ;;  %v71_v5 = vld [vmem:[#allocation3 + $0x40] sm:$0xf] }
  0x29   :  { %55 = vst [vmem:[#allocation2 + $0x8] sm:$0xf] %v856_v0  ;;  %56 = vst [vmem:[#allocation2 + $0xc] sm:$0xf] %v856_v0  ;;  %v70_v8 = vld [vmem:[#allocation3 + $0x20] sm:$0xf] }
  0x2a   :  { %57 = vst [vmem:[#allocation2 + $0x10] sm:$0xf] %v856_v0  ;;  %58 = vst [vmem:[#allocation2 + $0x14] sm:$0xf] %v856_v0  ;;  %v101_v10 = vld [vmem:[#allocation3 + $0x4] sm:$0xf] }
  0x2b   :  { %59 = vst [vmem:[#allocation2 + $0x18] sm:$0xf] %v856_v0  ;;  %60 = vst [vmem:[#allocation2 + $0x1c] sm:$0xf] %v856_v0  ;;  %v72_v12 = vld [vmem:[#allocation3 + $0x60] sm:$0xf] }
  0x2c   :  { %v103_v15 = vld [vmem:[#allocation3 + $0x44] sm:$0xf]  ;;  %v73_v18 = vld [vmem:[#allocation3 + $0x80] sm:$0xf]  ;;  %v133_v29 = vld [vmem:[#allocation3 + $0x8] sm:$0xf] }
  0x2d   :  { %v102_v22 = vld [vmem:[#allocation3 + $0x24] sm:$0xf]  ;;  %v74_v25 = vld [vmem:[#allocation3 + $0xa0] sm:$0xf]  ;;  %v135_v37 = vld [vmem:[#allocation3 + $0x48] sm:$0xf] }
  0x2e   :  { %v104_v27 = vld [vmem:[#allocation3 + $0x64] sm:$0xf]  ;;  %v75_v32 = vld [vmem:[#allocation3 + $0xc0] sm:$0xf]  ;;  %v134_v45 = vld [vmem:[#allocation3 + $0x28] sm:$0xf] }
  0x2f   :  { %v61_v2 = vld [vmem:[#allocation2] sm:$0xf]  ;;  %v62_v7 = vld [vmem:[#allocation2 + $0x4] sm:$0xf]  ;;  %v136_v51 = vld [vmem:[#allocation3 + $0x68] sm:$0xf] }
  0x30   :  { %v77_v3 = vadd.f32 %v69_v1, %v61_v2  ;;  %v63_v4 = vld [vmem:[#allocation2 + $0x8] sm:$0xf]  ;;  %v78_v9 = vadd.f32 %v70_v8, %v62_v7  ;;  %v64_v11 = vld [vmem:[#allocation2 + $0xc] sm:$0xf]  ;;  %v105_v34 = vld [vmem:[#allocation3 + $0x84] sm:$0xf] }
  0x31   :  { %v79_v6 = vadd.f32 %v71_v5, %v63_v4  ;;  %v80_v13 = vadd.f32 %v72_v12, %v64_v11  ;;  %v65_v17 = vld [vmem:[#allocation2 + $0x10] sm:$0xf]  ;;  %v66_v23 = vld [vmem:[#allocation2 + $0x14] sm:$0xf]  ;;  %v76_v43 = vld [vmem:[#allocation3 + $0xe0] sm:$0xf] }
  0x32   :  { %85 = vst [vmem:[#allocation2] sm:$0xf] %v77_v3  ;;  %86 = vst [vmem:[#allocation2 + $0x4] sm:$0xf] %v78_v9  ;;  %v81_v20 = vadd.f32 %v73_v18, %v65_v17  ;;  %v82_v28 = vadd.f32 %v74_v25, %v66_v23  ;;  %v67_v31 = vld [vmem:[#allocation2 + $0x18] sm:$0xf] }
  0x33   :  { %87 = vst [vmem:[#allocation2 + $0x8] sm:$0xf] %v79_v6  ;;  %88 = vst [vmem:[#allocation2 + $0xc] sm:$0xf] %v80_v13  ;;  %v83_v35 = vadd.f32 %v75_v32, %v67_v31  ;;  %v68_v42 = vld [vmem:[#allocation2 + $0x1c] sm:$0xf] }
  0x34   :  { %89 = vst [vmem:[#allocation2 + $0x10] sm:$0xf] %v81_v20  ;;  %90 = vst [vmem:[#allocation2 + $0x14] sm:$0xf] %v82_v28  ;;  %v106_v46 = vld [vmem:[#allocation3 + $0xa4] sm:$0xf]  ;;  %v84_v47 = vadd.f32 %v76_v43, %v68_v42 }
  0x35   :  { %91 = vst [vmem:[#allocation2 + $0x18] sm:$0xf] %v83_v35  ;;  %v107_v53 = vld [vmem:[#allocation3 + $0xc4] sm:$0xf]  ;;  %v165_v54 = vld [vmem:[#allocation3 + $0xc] sm:$0xf] }
  0x36   :  { %92 = vst [vmem:[#allocation2 + $0x1c] sm:$0xf] %v84_v47  ;;  %v137_v58 = vld [vmem:[#allocation3 + $0x88] sm:$0xf]  ;;  %v167_v61 = vld [vmem:[#allocation3 + $0x4c] sm:$0xf] }
  0x37   :  { %v108_v62 = vld [vmem:[#allocation3 + $0xe4] sm:$0xf]  ;;  %v166_v6 = vld [vmem:[#allocation3 + $0x2c] sm:$0xf]  ;;  %v138_v7 = vld [vmem:[#allocation3 + $0xa8] sm:$0xf] }
  0x38   :  { %v168_v12 = vld [vmem:[#allocation3 + $0x6c] sm:$0xf]  ;;  %v140_v23 = vld [vmem:[#allocation3 + $0xe8] sm:$0xf]  ;;  %v201_v43 = vld [vmem:[#allocation3 + $0x90] sm:$0xf] }
  0x39   :  { %v93_v14 = vld [vmem:[#allocation2] sm:$0xf]  ;;  %v94_v24 = vld [vmem:[#allocation2 + $0x4] sm:$0xf]  ;;  %v170_v31 = vld [vmem:[#allocation3 + $0xac] sm:$0xf] }
  0x3a   :  { %v109_v16 = vadd.f32 %v101_v10, %v93_v14  ;;  %v95_v19 = vld [vmem:[#allocation2 + $0x8] sm:$0xf]  ;;  %v110_v26 = vadd.f32 %v102_v22, %v94_v24  ;;  %v96_v30 = vld [vmem:[#allocation2 + $0xc] sm:$0xf]  ;;  %v199_v22 = vld [vmem:[#allocation3 + $0x50] sm:$0xf] }
  0x3b   :  { %v111_v21 = vadd.f32 %v103_v15, %v95_v19  ;;  %v112_v33 = vadd.f32 %v104_v27, %v96_v30  ;;  %v97_v39 = vld [vmem:[#allocation2 + $0x10] sm:$0xf]  ;;  %v98_v49 = vld [vmem:[#allocation2 + $0x14] sm:$0xf]  ;;  %v139_v14 = vld [vmem:[#allocation3 + $0xc8] sm:$0xf] }
  0x3c   :  { %117 = vst [vmem:[#allocation2] sm:$0xf] %v109_v16  ;;  %118 = vst [vmem:[#allocation2 + $0x4] sm:$0xf] %v110_v26  ;;  %v113_v41 = vadd.f32 %v105_v34, %v97_v39  ;;  %v114_v52 = vadd.f32 %v106_v46, %v98_v49  ;;  %v99_v56 = vld [vmem:[#allocation2 + $0x18] sm:$0xf] }
  0x3d   :  { %119 = vst [vmem:[#allocation2 + $0x8] sm:$0xf] %v111_v21  ;;  %120 = vst [vmem:[#allocation2 + $0xc] sm:$0xf] %v112_v33  ;;  %v115_v59 = vadd.f32 %v107_v53, %v99_v56  ;;  %v100_v4 = vld [vmem:[#allocation2 + $0x1c] sm:$0xf] }
  0x3e   :  { %121 = vst [vmem:[#allocation2 + $0x10] sm:$0xf] %v113_v41  ;;  %122 = vst [vmem:[#allocation2 + $0x14] sm:$0xf] %v114_v52  ;;  %v116_v8 = vadd.f32 %v108_v62, %v100_v4  ;;  %v197_v15 = vld [vmem:[#allocation3 + $0x10] sm:$0xf] }
  0x3f   :  { %123 = vst [vmem:[#allocation2 + $0x18] sm:$0xf] %v115_v59  ;;  %v169_v19 = vld [vmem:[#allocation3 + $0x8c] sm:$0xf]  ;;  %v198_v30 = vld [vmem:[#allocation3 + $0x30] sm:$0xf] }
  0x40   :  { %124 = vst [vmem:[#allocation2 + $0x1c] sm:$0xf] %v116_v8  ;;  %v229_v39 = vld [vmem:[#allocation3 + $0x14] sm:$0xf]  ;;  %v172_v47 = vld [vmem:[#allocation3 + $0xec] sm:$0xf] }
  0x41   :  { %v231_v46 = vld [vmem:[#allocation3 + $0x54] sm:$0xf]  ;;  %v203_v62 = vld [vmem:[#allocation3 + $0xd0] sm:$0xf]  ;;  %vm857_vm1 = vmmov 0   ;;  %vm412_vm2 = vcmask 1041409  }
  0x42   :  { %v233_v4 = vld [vmem:[#allocation3 + $0x94] sm:$0xf]  ;;  %v204_v8 = vld [vmem:[#allocation3 + $0xf0] sm:$0xf]  ;;  %702 = vmatprep.mubr.msk.f32.mxu0 %vm857_vm1, %v856_v0  ;;  %737 = vmatprep.mubr.msk.f32.mxu1 %vm857_vm1, %v856_v0  ;;  %v678_v0 = vld [vmem:[#allocation6 + $0x28] sm:$0xff]   ;;  %vm414_vm3 = vcmask 1042434  }
  0x43   :  { %v125_v36 = vld [vmem:[#allocation2] sm:$0xf]  ;;  %v126_v48 = vld [vmem:[#allocation2 + $0x4] sm:$0xf]  ;;  %vm416_vm4 = vcmask 1043459   ;;  %vm418_vm5 = vcmask 1044484  }
  0x44   :  { %v141_v38 = vadd.f32 %v133_v29, %v125_v36  ;;  %v127_v40 = vld [vmem:[#allocation2 + $0x8] sm:$0xf]  ;;  %v142_v50 = vadd.f32 %v134_v45, %v126_v48  ;;  %v128_v55 = vld [vmem:[#allocation2 + $0xc] sm:$0xf]  ;;  %v200_v36 = vld [vmem:[#allocation3 + $0x70] sm:$0xf] }
  0x45   :  { %v143_v44 = vadd.f32 %v135_v37, %v127_v40  ;;  %v144_v57 = vadd.f32 %v136_v51, %v128_v55  ;;  %v129_v1 = vld [vmem:[#allocation2 + $0x10] sm:$0xf]  ;;  %v130_v10 = vld [vmem:[#allocation2 + $0x14] sm:$0xf]  ;;  %vm420_vm6 = vcmask 1045509   ;;  %vm422_vm7 = vcmask 1046534  }
  0x46   :  { %149 = vst [vmem:[#allocation2] sm:$0xf] %v141_v38  ;;  %150 = vst [vmem:[#allocation2 + $0x4] sm:$0xf] %v142_v50  ;;  %v145_v3 = vadd.f32 %v137_v58, %v129_v1  ;;  %v146_v13 = vadd.f32 %v138_v7, %v130_v10  ;;  %v131_v17 = vld [vmem:[#allocation2 + $0x18] sm:$0xf] }
  0x47   :  { %151 = vst [vmem:[#allocation2 + $0x8] sm:$0xf] %v143_v44  ;;  %152 = vst [vmem:[#allocation2 + $0xc] sm:$0xf] %v144_v57  ;;  %v147_v20 = vadd.f32 %v139_v14, %v131_v17  ;;  %v132_v28 = vld [vmem:[#allocation2 + $0x1c] sm:$0xf] }
  0x48   :  { %153 = vst [vmem:[#allocation2 + $0x10] sm:$0xf] %v145_v3  ;;  %154 = vst [vmem:[#allocation2 + $0x14] sm:$0xf] %v146_v13  ;;  %v148_v32 = vadd.f32 %v140_v23, %v132_v28  ;;  %v171_v38 = vld [vmem:[#allocation3 + $0xcc] sm:$0xf] }
  0x49   :  { %155 = vst [vmem:[#allocation2 + $0x18] sm:$0xf] %v147_v20  ;;  %v202_v55 = vld [vmem:[#allocation3 + $0xb0] sm:$0xf]  ;;  %v263_v7 = vld [vmem:[#allocation3 + $0x58] sm:$0xf] }
  0x4a   :  { %156 = vst [vmem:[#allocation2 + $0x1c] sm:$0xf] %v148_v32  ;;  %v235_v23 = vld [vmem:[#allocation3 + $0xd4] sm:$0xf]  ;;  %v265_v28 = vld [vmem:[#allocation3 + $0x98] sm:$0xf] }
  0x4b   :  { %v236_v32 = vld [vmem:[#allocation3 + $0xf4] sm:$0xf]  ;;  %vm424_vm8 = vcmask 1047559   ;;  %vm426_vm9 = vcmask 31744  }
  0x4d   :  { %v157_v60 = vld [vmem:[#allocation2] sm:$0xf]  ;;  %v158_v9 = vld [vmem:[#allocation2 + $0x4] sm:$0xf] }
  0x4e   :  { %v173_v63 = vadd.f32 %v165_v54, %v157_v60  ;;  %v159_v2 = vld [vmem:[#allocation2 + $0x8] sm:$0xf]  ;;  %v174_v11 = vadd.f32 %v166_v6, %v158_v9  ;;  %v160_v16 = vld [vmem:[#allocation2 + $0xc] sm:$0xf]  ;;  %v230_v54 = vld [vmem:[#allocation3 + $0x34] sm:$0xf] }
  0x4f   :  { %v175_v5 = vadd.f32 %v167_v61, %v159_v2  ;;  %v176_v18 = vadd.f32 %v168_v12, %v160_v16  ;;  %v161_v25 = vld [vmem:[#allocation2 + $0x10] sm:$0xf]  ;;  %v162_v34 = vld [vmem:[#allocation2 + $0x14] sm:$0xf] }
  0x50   :  { %181 = vst [vmem:[#allocation2] sm:$0xf] %v173_v63  ;;  %182 = vst [vmem:[#allocation2 + $0x4] sm:$0xf] %v174_v11  ;;  %v177_v27 = vadd.f32 %v169_v19, %v161_v25  ;;  %v178_v37 = vadd.f32 %v170_v31, %v162_v34  ;;  %v163_v41 = vld [vmem:[#allocation2 + $0x18] sm:$0xf] }
  0x51   :  { %183 = vst [vmem:[#allocation2 + $0x8] sm:$0xf] %v175_v5  ;;  %184 = vst [vmem:[#allocation2 + $0xc] sm:$0xf] %v176_v18  ;;  %v179_v44 = vadd.f32 %v171_v38, %v163_v41  ;;  %v164_v52 = vld [vmem:[#allocation2 + $0x1c] sm:$0xf] }
  0x52   :  { %185 = vst [vmem:[#allocation2 + $0x10] sm:$0xf] %v177_v27  ;;  %186 = vst [vmem:[#allocation2 + $0x14] sm:$0xf] %v178_v37  ;;  %v180_v56 = vadd.f32 %v172_v47, %v164_v52  ;;  %v232_v60 = vld [vmem:[#allocation3 + $0x74] sm:$0xf] }
  0x53   :  { %187 = vst [vmem:[#allocation2 + $0x18] sm:$0xf] %v179_v44  ;;  %v261_v63 = vld [vmem:[#allocation3 + $0x18] sm:$0xf]  ;;  %v234_v16 = vld [vmem:[#allocation3 + $0xb4] sm:$0xf] }
  0x54   :  { %188 = vst [vmem:[#allocation2 + $0x1c] sm:$0xf] %v180_v56  ;;  %v295_v31 = vld [vmem:[#allocation3 + $0x5c] sm:$0xf]  ;;  %v267_v47 = vld [vmem:[#allocation3 + $0xd8] sm:$0xf] }
  0x57   :  { %v189_v21 = vld [vmem:[#allocation2] sm:$0xf]  ;;  %v190_v33 = vld [vmem:[#allocation2 + $0x4] sm:$0xf] }
  0x58   :  { %v205_v24 = vadd.f32 %v197_v15, %v189_v21  ;;  %v191_v26 = vld [vmem:[#allocation2 + $0x8] sm:$0xf]  ;;  %v206_v35 = vadd.f32 %v198_v30, %v190_v33  ;;  %v192_v40 = vld [vmem:[#allocation2 + $0xc] sm:$0xf]  ;;  %v262_v15 = vld [vmem:[#allocation3 + $0x38] sm:$0xf] }
  0x59   :  { %v207_v29 = vadd.f32 %v199_v22, %v191_v26  ;;  %v208_v42 = vadd.f32 %v200_v36, %v192_v40  ;;  %v193_v49 = vld [vmem:[#allocation2 + $0x10] sm:$0xf]  ;;  %v194_v58 = vld [vmem:[#allocation2 + $0x14] sm:$0xf]  ;;  %v264_v21 = vld [vmem:[#allocation3 + $0x78] sm:$0xf] }
  0x5a   :  { %213 = vst [vmem:[#allocation2] sm:$0xf] %v205_v24  ;;  %214 = vst [vmem:[#allocation2 + $0x4] sm:$0xf] %v206_v35  ;;  %v209_v51 = vadd.f32 %v201_v43, %v193_v49  ;;  %v210_v61 = vadd.f32 %v202_v55, %v194_v58  ;;  %v195_v2 = vld [vmem:[#allocation2 + $0x18] sm:$0xf] }
  0x5b   :  { %215 = vst [vmem:[#allocation2 + $0x8] sm:$0xf] %v207_v29  ;;  %216 = vst [vmem:[#allocation2 + $0xc] sm:$0xf] %v208_v42  ;;  %v211_v5 = vadd.f32 %v203_v62, %v195_v2  ;;  %v196_v13 = vld [vmem:[#allocation2 + $0x1c] sm:$0xf] }
  0x5c   :  { %217 = vst [vmem:[#allocation2 + $0x10] sm:$0xf] %v209_v51  ;;  %218 = vst [vmem:[#allocation2 + $0x14] sm:$0xf] %v210_v61  ;;  %v212_v17 = vadd.f32 %v204_v8, %v196_v13  ;;  %v293_v24 = vld [vmem:[#allocation3 + $0x1c] sm:$0xf] }
  0x5d   :  { %219 = vst [vmem:[#allocation2 + $0x18] sm:$0xf] %v211_v5  ;;  %v266_v40 = vld [vmem:[#allocation3 + $0xb8] sm:$0xf]  ;;  %v297_v51 = vld [vmem:[#allocation3 + $0x9c] sm:$0xf] }
  0x5e   :  { %220 = vst [vmem:[#allocation2 + $0x1c] sm:$0xf] %v212_v17  ;;  %v298_v61 = vld [vmem:[#allocation3 + $0xbc] sm:$0xf] }
  0x61   :  { %v221_v45 = vld [vmem:[#allocation2] sm:$0xf]  ;;  %v222_v57 = vld [vmem:[#allocation2 + $0x4] sm:$0xf] }
  0x62   :  { %v237_v48 = vadd.f32 %v229_v39, %v221_v45  ;;  %v223_v50 = vld [vmem:[#allocation2 + $0x8] sm:$0xf]  ;;  %v238_v59 = vadd.f32 %v230_v54, %v222_v57  ;;  %v224_v1 = vld [vmem:[#allocation2 + $0xc] sm:$0xf]  ;;  %v294_v39 = vld [vmem:[#allocation3 + $0x3c] sm:$0xf] }
  0x63   :  { %v239_v53 = vadd.f32 %v231_v46, %v223_v50  ;;  %v240_v3 = vadd.f32 %v232_v60, %v224_v1  ;;  %v225_v10 = vld [vmem:[#allocation2 + $0x10] sm:$0xf]  ;;  %v226_v19 = vld [vmem:[#allocation2 + $0x14] sm:$0xf]  ;;  %v296_v45 = vld [vmem:[#allocation3 + $0x7c] sm:$0xf] }
  0x64   :  { %245 = vst [vmem:[#allocation2] sm:$0xf] %v237_v48  ;;  %246 = vst [vmem:[#allocation2 + $0x4] sm:$0xf] %v238_v59  ;;  %v241_v12 = vadd.f32 %v233_v4, %v225_v10  ;;  %v242_v22 = vadd.f32 %v234_v16, %v226_v19  ;;  %v227_v26 = vld [vmem:[#allocation2 + $0x18] sm:$0xf] }
  0x65   :  { %247 = vst [vmem:[#allocation2 + $0x8] sm:$0xf] %v239_v53  ;;  %248 = vst [vmem:[#allocation2 + $0xc] sm:$0xf] %v240_v3  ;;  %v243_v29 = vadd.f32 %v235_v23, %v227_v26  ;;  %v228_v37 = vld [vmem:[#allocation2 + $0x1c] sm:$0xf] }
  0x66   :  { %249 = vst [vmem:[#allocation2 + $0x10] sm:$0xf] %v241_v12  ;;  %250 = vst [vmem:[#allocation2 + $0x14] sm:$0xf] %v242_v22  ;;  %v244_v41 = vadd.f32 %v236_v32, %v228_v37  ;;  %v268_v54 = vld [vmem:[#allocation3 + $0xf8] sm:$0xf] }
  0x67   :  { %251 = vst [vmem:[#allocation2 + $0x18] sm:$0xf] %v243_v29  ;;  %v299_v4 = vld [vmem:[#allocation3 + $0xdc] sm:$0xf]  ;;  %v643_v22 = vld [vmem:[#allocation6] sm:$0xff]   ;;  %v858_v23 = vmov 0.0|0.0   ;;  %v378_v29 = vlaneseq }
  0x68   :  { %252 = vst [vmem:[#allocation2 + $0x1c] sm:$0xf] %v244_v41  ;;  %740 = vmatprep.subr.bf16.mxu1 %v858_v23  ;;  %v676_v26 = vld [vmem:[#allocation6 + $0x18] sm:$0xff]  }
  0x69   :  { %742 = vmatpush3.bf16.msra.mxu1 %v643_v22  ;;  %v381_v32 = vshrl.u32 %v378_v29, 7 }
  0x6a   :  { %743 = vmatprep.subr.bf16.mxu1 %v858_v23 }
  0x6b   :  { %v253_v6 = vld [vmem:[#allocation2] sm:$0xf]  ;;  %v254_v18 = vld [vmem:[#allocation2 + $0x4] sm:$0xf] }
  0x6c   :  { %v269_v9 = vadd.f32 %v261_v63, %v253_v6  ;;  %v255_v11 = vld [vmem:[#allocation2 + $0x8] sm:$0xf]  ;;  %v270_v20 = vadd.f32 %v262_v15, %v254_v18  ;;  %v256_v25 = vld [vmem:[#allocation2 + $0xc] sm:$0xf] }
  0x6d   :  { %v271_v14 = vadd.f32 %v263_v7, %v255_v11  ;;  %v272_v27 = vadd.f32 %v264_v21, %v256_v25  ;;  %v257_v34 = vld [vmem:[#allocation2 + $0x10] sm:$0xf]  ;;  %v258_v43 = vld [vmem:[#allocation2 + $0x14] sm:$0xf] }
  0x6e   :  { %277 = vst [vmem:[#allocation2] sm:$0xf] %v269_v9  ;;  %278 = vst [vmem:[#allocation2 + $0x4] sm:$0xf] %v270_v20  ;;  %v273_v36 = vadd.f32 %v265_v28, %v257_v34  ;;  %v274_v46 = vadd.f32 %v266_v40, %v258_v43  ;;  %v259_v49 = vld [vmem:[#allocation2 + $0x18] sm:$0xf] }
  0x6f   :  { %279 = vst [vmem:[#allocation2 + $0x8] sm:$0xf] %v271_v14  ;;  %280 = vst [vmem:[#allocation2 + $0xc] sm:$0xf] %v272_v27  ;;  %v275_v52 = vadd.f32 %v267_v47, %v259_v49  ;;  %v260_v59 = vld [vmem:[#allocation2 + $0x1c] sm:$0xf] }
  0x70   :  { %281 = vst [vmem:[#allocation2 + $0x10] sm:$0xf] %v273_v36  ;;  %282 = vst [vmem:[#allocation2 + $0x14] sm:$0xf] %v274_v46  ;;  %v276_v62 = vadd.f32 %v268_v54, %v260_v59  ;;  %v300_v9 = vld [vmem:[#allocation3 + $0xfc] sm:$0xf] }
  0x71   :  { %283 = vst [vmem:[#allocation2 + $0x18] sm:$0xf] %v275_v52  ;;  %v361_v20 = vld [vmem:[%s956_s1] sm:$0x3]  ;;  %v675_v25 = vld [vmem:[#allocation6 + $0x10] sm:$0xff]  }
  0x72   :  { %284 = vst [vmem:[#allocation2 + $0x1c] sm:$0xf] %v276_v62  ;;  %v362_v21 = vunpack.c.l.bf16 %v361_v20  ;;  %v677_v27 = vld [vmem:[#allocation6 + $0x20] sm:$0xff]   ;;  %v679_v28 = vld [vmem:[#allocation6 + $0x30] sm:$0xff]  }
  0x74   :  { %701 = vmatpush3.msk.msra.mxu0 %vm328_vm0, %v362_v21 }
  0x75   :  { %v285_v30 = vld [vmem:[#allocation2] sm:$0xf]  ;;  %v286_v42 = vld [vmem:[#allocation2 + $0x4] sm:$0xf] }
  0x76   :  { %v301_v33 = vadd.f32 %v293_v24, %v285_v30  ;;  %v287_v35 = vld [vmem:[#allocation2 + $0x8] sm:$0xf]  ;;  %v302_v44 = vadd.f32 %v294_v39, %v286_v42  ;;  %v288_v48 = vld [vmem:[#allocation2 + $0xc] sm:$0xf] }
  0x77   :  { %v303_v38 = vadd.f32 %v295_v31, %v287_v35  ;;  %v304_v50 = vadd.f32 %v296_v45, %v288_v48  ;;  %v289_v56 = vld [vmem:[#allocation2 + $0x10] sm:$0xf]  ;;  %v290_v1 = vld [vmem:[#allocation2 + $0x14] sm:$0xf]  ;;  %v674_v24 = vld [vmem:[#allocation6 + $0x8] sm:$0xff]   ;;  %v379_v31 = vand.u32 127, %v378_v29 }
  0x78   :  { %309 = vst [vmem:[#allocation2] sm:$0xf] %v301_v33  ;;  %310 = vst [vmem:[#allocation2 + $0x4] sm:$0xf] %v302_v44  ;;  %v305_v58 = vadd.f32 %v297_v51, %v289_v56  ;;  %v306_v3 = vadd.f32 %v298_v61, %v290_v1  ;;  %v291_v6 = vld [vmem:[#allocation2 + $0x18] sm:$0xf]  ;;  %745 = vmatpush3.bf16.msra.mxu1 %v674_v24 }
  0x79   :  { %311 = vst [vmem:[#allocation2 + $0x8] sm:$0xf] %v303_v38  ;;  %312 = vst [vmem:[#allocation2 + $0xc] sm:$0xf] %v304_v50  ;;  %v307_v8 = vadd.f32 %v299_v4, %v291_v6  ;;  %v292_v12 = vld [vmem:[#allocation2 + $0x1c] sm:$0xf]  ;;  %746 = vmatprep.subr.bf16.mxu1 %v858_v23  ;;  %v382_v34 = vsub.s32 %v379_v31, %v381_v32 }
  0x7a   :  { %313 = vst [vmem:[#allocation2 + $0x10] sm:$0xf] %v305_v58  ;;  %314 = vst [vmem:[#allocation2 + $0x14] sm:$0xf] %v306_v3  ;;  %v308_v13 = vadd.f32 %v300_v9, %v292_v12  ;;  %v680_v1 = vld [vmem:[#allocation6 + $0x38] sm:$0xff]  }
  0x7b   :  { %315 = vst [vmem:[#allocation2 + $0x18] sm:$0xf] %v307_v8 }
  0x7c   :  { %316 = vst [vmem:[#allocation2 + $0x1c] sm:$0xf] %v308_v13  ;;  %748 = vmatpush3.bf16.msra.mxu1 %v675_v25 }
  0x7d   :  { %749 = vmatprep.subr.bf16.mxu1 %v858_v23 }
  0x7f   :  { %v320_v53 = vld [vmem:[#allocation2] sm:$0xf]  ;;  %v321_v63 = vld [vmem:[#allocation2 + $0x4] sm:$0xf] }
  0x80   :  { %v329_v55 = vsel %vm328_vm0, %v320_v53, 0.0  ;;  %v322_v57 = vld [vmem:[#allocation2 + $0x8] sm:$0xf]  ;;  %v332_v2 = vsel %vm328_vm0, %v321_v63, 0.0  ;;  %v323_v5 = vld [vmem:[#allocation2 + $0xc] sm:$0xf]  ;;  %751 = vmatpush3.bf16.msra.mxu1 %v676_v26 }
  0x81   :  { %330 = vadd.xlane.f32.xlu0 %v329_v55  ;;  %v335_v60 = vsel %vm328_vm0, %v322_v57, 0.0  ;;  %v338_v7 = vsel %vm328_vm0, %v323_v5, 0.0  ;;  %v324_v10 = vld [vmem:[#allocation2 + $0x10] sm:$0xf]  ;;  %v325_v14 = vld [vmem:[#allocation2 + $0x14] sm:$0xf]  ;;  %752 = vmatprep.subr.bf16.mxu1 %v858_v23 }
  0x82   :  { %336 = vadd.xlane.f32.xlu1 %v335_v60  ;;  %v341_v11 = vsel %vm328_vm0, %v324_v10, 0.0  ;;  %v344_v15 = vsel %vm328_vm0, %v325_v14, 0.0  ;;  %v326_v16 = vld [vmem:[#allocation2 + $0x18] sm:$0xf] }
  0x83   :  { %v347_v17 = vsel %vm328_vm0, %v326_v16, 0.0  ;;  %v327_v18 = vld [vmem:[#allocation2 + $0x1c] sm:$0xf] }
  0x84   :  { %v350_v19 = vsel %vm328_vm0, %v327_v18, 0.0  ;;  %754 = vmatpush3.bf16.msra.mxu1 %v677_v27 }
  0x85   :  { %333 = vadd.xlane.f32.xlu0 %v332_v2  ;;  %755 = vmatprep.subr.bf16.mxu1 %v858_v23  ;;  %v638_v2 = vld [vmem:[%s957_s2] ss:$0 sm:$0xff]  ;;  %s859_s2 = smov [#allocation8]  }
  0x86   :  { %339 = vadd.xlane.f32.xlu1 %v338_v7  ;;  %v641_v7 = vld [vmem:[%s959_s4] ss:$0 sm:$0xff]  ;;  %s628_s24 = sshll.u32 %s859_s2, 4  ;;  %s629_s24 = int_to_ptr.vmem [resolvable:$true] %s628_s24 }
  0x87   :  { %s822_s25 = scalar_lea.vmem %s629_s24, 128  ;;  %p827_p3 = scmp.lt.s32.totalorder %s629_s24, %s629_s24 }
  0x88   :  { %757 = vmatpush3.bf16.msra.mxu1 %v678_v0  ;;  %p823_p2 = scmp.ne.s32.totalorder %s629_s24, %s822_s25  ;;  %p828_p4 = scmp.lt.s32.totalorder %s822_s25, %s822_s25 }
  0x89   :  { %342 = vadd.xlane.f32.xlu0 %v341_v11  ;;  %758 = vmatprep.subr.bf16.mxu1 %v858_v23 }
  0x8a   :  { %345 = vadd.xlane.f32.xlu1 %v344_v15  ;;  %p829_p5 = por %p828_p4, %p827_p3 }
  0x8c   :  { %760 = vmatpush3.bf16.msra.mxu1 %v679_v28  ;;  %p830_p6 = pnand %p829_p5, %p823_p2 }
  0x8d   :  { %348 = vadd.xlane.f32.xlu0 %v347_v17  ;;  %761 = vmatprep.subr.bf16.mxu1 %v858_v23 }
  0x8e   :  { %351 = vadd.xlane.f32.xlu1 %v350_v19 }
  0x90   :  { %763 = vmatpush3.bf16.msra.mxu1 %v680_v1 }
 0x10e   :  { %v331_v30 = vpop.xlane.xlu0 %330 }
 0x10f   :  { %v337_v33 = vpop.xlane.xlu1 %336  ;;  %v353_v35 = vmul.f32 0.0009765625, %v331_v30 }
 0x110   :  { %v355_v38 = vmul.f32 0.0009765625, %v337_v33 }
 0x111   :  { %v383_v41 = vrot.slane %v353_v35, %v382_v34 }
 0x112   :  { %v334_v36 = vpop.xlane.xlu0 %333  ;;  %v391_v45 = vrot.slane %v355_v38, %v382_v34 }
 0x113   :  { %v354_v37 = vmul.f32 0.0009765625, %v334_v36  ;;  %v340_v40 = vpop.xlane.xlu1 %339 }
 0x114   :  { %v356_v42 = vmul.f32 0.0009765625, %v340_v40 }
 0x115   :  { %v387_v39 = vrot.slane %v354_v37, %v382_v34 }
 0x116   :  { %v343_v44 = vpop.xlane.xlu0 %342  ;;  %v395_v47 = vrot.slane %v356_v42, %v382_v34 }
 0x117   :  { %v413_v43 = vsel %vm412_vm2, %v387_v39, %v383_v41  ;;  %v357_v46 = vmul.f32 0.0009765625, %v343_v44  ;;  %v346_v49 = vpop.xlane.xlu1 %345 }
 0x118   :  { %v415_v48 = vsel %vm414_vm3, %v391_v45, %v413_v43  ;;  %v358_v51 = vmul.f32 0.0009765625, %v346_v49 }
 0x119   :  { %v399_v50 = vrot.slane %v357_v46, %v382_v34  ;;  %v417_v52 = vsel %vm416_vm4, %v395_v47, %v415_v48 }
 0x11a   :  { %v349_v53 = vpop.xlane.xlu0 %348  ;;  %v403_v54 = vrot.slane %v358_v51, %v382_v34 }
 0x11b   :  { %v359_v55 = vmul.f32 0.0009765625, %v349_v53  ;;  %v419_v56 = vsel %vm418_vm5, %v399_v50, %v417_v52  ;;  %v352_v58 = vpop.xlane.xlu1 %351 }
 0x11c   :  { %v421_v59 = vsel %vm420_vm6, %v403_v54, %v419_v56  ;;  %v360_v60 = vmul.f32 0.0009765625, %v352_v58 }
 0x11d   :  { %v407_v57 = vrot.slane %v359_v55, %v382_v34 }
 0x11e   :  { %v411_v62 = vrot.slane %v360_v60, %v382_v34 }
 0x11f   :  { %v423_v61 = vsel %vm422_vm7, %v407_v57, %v421_v59 }
 0x120   :  { %v425_v63 = vsel %vm424_vm8, %v411_v62, %v423_v61 }
 0x121   :  { %703 = vmatmul.mubr.msk.f32.vlgmr.msra.gmra.mrb[0].mxu0 %vm426_vm9, %v425_v63 }
 0x1f4   :  { %v498_v3 = vpop.f32.mrb[0].mxu0 }
 0x1f5   :  { %v499_v4 = vadd.f32 %v638_v2, %v498_v3  ;;  %v704_v5 = vpop.f32.mrb[1].mxu0 }
 0x1f7   :  { %v502_v6 = vmax.f32 %v499_v4, 0.0 }
 0x1f9   :  { %738 = vmatmul.mubr.f32.vlgmr.msra.gmra.mrb[0].mxu1 %v502_v6 }
 0x2cc   :  { %v608_v8 = vpop.f32.mrb[0].mxu1 }
 0x2cd   :  { %v609_v9 = vadd.f32 %v641_v7, %v608_v8  ;;  %v739_v10 = vpop.f32.mrb[1].mxu1 }
 0x2cf   :  { %612 = vmax.xlane.f32.xlu0 %v609_v9 }
 0x35c   :  { %v613_v11 = vpop.xlane.xlu0 %612 }
 0x35d   :  { %v614_v12 = vsub.f32 %v609_v9, %v613_v11 }
 0x35f   :  { %v615_v13 = vmul.f32 1.442695, %v614_v12 }
 0x361   :  { %774 = vpow2.f32 %v615_v13 }
 0x36b   :  { %v775_v14 = vpop.eup %774 }
 0x36c   :  { %617 = vadd.xlane.f32.xlu1 %v775_v14 }
 0x3f9   :  { %v618_v15 = vpop.xlane.xlu1 %617 }
 0x3fa   :  { %776 = vrcp.f32 %v618_v15 }
 0x404   :  { %v777_v16 = vpop.eup %776 }
 0x405   :  { %v620_v17 = vmul.f32 %v777_v16, %v775_v14 }
 0x407   :  { %621 = vst [vmem:[#allocation8] sm:$0xff] %v620_v17 }
 0x408   :  { %833 = shalt.err (!%p830_p6)
}
 0x409   :  { %s834_s27 = scalar_lea.hbm %s960_s5, 128 }
 0x40a   :  { %p835_p7 = scmp.ne.s32.totalorder %s960_s5, %s834_s27  ;;  %p838_p8 = scmp.lt.u32.totalorder %s834_s27, %s960_s5 }
 0x40c   :  { %p840_p9 = pnand %p838_p8, %p835_p7 }
 0x40e   :  { %843 = shalt.err (!%p840_p9)
}
 0x40f   :  { %631 = dma.vmem_to_hbm [thread:$0]  %s629_s24, 128, %s960_s5, [#allocation5]  }
 0x410   :  { %848 = dma.done.wait [#allocation5], 128  }
 0x411   :  { %849 = vsyncadd [#allocation5], 4294967168 }
 0x412   :  { %635 = vsyncpa [#allocation4], 1 }
 0x413   :  { %636 = vsyncpa [#allocation7], 1 }
 0x414   :  { %637 = vsyncpa [#allocation5], 1 }

</bundles_post_ra>
